<compile_context>
chip_gen: v6e
topology: v6e:2x2x1
jax: 0.10.0
libtpu: 0.0.40
codegen_flags: <defaults>
</compile_context>

<pallas_src>
import functools

import jax
import jax.numpy as jnp
from jax.experimental import pallas as pl
from jax.experimental.pallas import tpu as pltpu


def _msd_kernel(x_ref, bits_ref, w_ref, b_ref, o_ref, *,
                K: int, field_bits: int, thr: int, inv_scale: float):
    x = x_ref[...]                                   # (TB, H) f32
    bits = bits_ref[...]                             # (TB, H) uint32
    fmask = jnp.uint32((1 << field_bits) - 1)
    thr_u = jnp.uint32(thr)

    # K Bernoulli(keep_prob) masks from K disjoint bit-fields of one uniform
    # 32-bit word; accumulate an integer keep-count (2 int ops / sample).
    count = ((bits & fmask) < thr_u).astype(jnp.int32)
    for k in range(1, K):                            # K is small & static
        field = (bits >> jnp.uint32(k * field_bits)) & fmask
        count = count + (field < thr_u).astype(jnp.int32)

    # mean_k( x * mask_k / keep ) == x * count / (K * keep)  -- single scale.
    acc = x * (count.astype(jnp.float32) * inv_scale)

    # Single MXU matmul on the averaged masked input (bf16 operands, f32 acc),
    # bias added once in f32.
    o_ref[...] = (
        jnp.dot(acc.astype(jnp.bfloat16), w_ref[...],
                preferred_element_type=jnp.float32)
        + b_ref[...]
    )


def multi_sample_dropout(x, w, b, key, *, K: int = 5, p: float = 0.5):
    """Training-mode forward of MultiSampleDropout.

    x: (B, H) f32, w: (H, L) f32 (transposed vs PyTorch), b: (L,) f32,
    key: jax PRNG key for the dropout masks.  Returns (B, L) f32.
    """
    assert 0.0 <= p < 1.0, "dropout prob must be in [0, 1)"
    assert 1 <= K <= 8
    B, H = x.shape
    L = w.shape[1]
    keep = 1.0 - p

    # One uint32 word per element; K disjoint fields of `field_bits` bits each.
    # p is quantized to 2**-field_bits resolution (exact for p=0.5, K<=5).
    field_bits = min(32 // K, 24)
    thr = int(round(keep * (1 << field_bits)))
    inv_scale = 1.0 / (K * keep)

    bits = jax.random.bits(key, (B, H), dtype=jnp.uint32)

    # Lane-dense weights / bias / output: pad num_labels to a multiple of 128.
    Lp = max(128, ((L + 127) // 128) * 128)
    w_p = jnp.zeros((H, Lp), jnp.bfloat16).at[:, :L].set(w.astype(jnp.bfloat16))
    b_p = jnp.zeros((1, Lp), jnp.float32).at[:, :L].set(jnp.reshape(b, (1, L)))

    # Batch tile: largest multiple of 8 that keeps the double-buffered x + bits
    # tiles comfortably inside scoped VMEM on every generation (incl. v7x).
    if B <= 8:
        tile_b = B
    else:
        cap = max(8, (4 * 1024 * 1024) // (4 * H))   # ~4 MiB f32 per x tile
        tile_b = max(8, (min(B, 512, cap) // 8) * 8)
    # TODO(synk): for very large H (x tile no longer fits VMEM) add a trailing
    # "arbitrary" reduction grid axis over H with a (tile_b, Lp) f32 scratch
    # accumulator (init/finalize under pl.when).

    grid = (pl.cdiv(B, tile_b),)
    kernel = functools.partial(_msd_kernel, K=K, field_bits=field_bits,
                               thr=thr, inv_scale=inv_scale)

    out_padded = pl.pallas_call(
        kernel,
        out_shape=jax.ShapeDtypeStruct((B, Lp), jnp.float32),
        grid=grid,
        in_specs=[
            pl.BlockSpec((tile_b, H), lambda i: (i, 0)),   # x tile
            pl.BlockSpec((tile_b, H), lambda i: (i, 0)),   # random-bits tile
            pl.BlockSpec((H, Lp), lambda i: (0, 0)),       # W   (resident)
            pl.BlockSpec((1, Lp), lambda i: (0, 0)),       # bias (resident)
        ],
        out_specs=pl.BlockSpec((tile_b, Lp), lambda i: (i, 0)),
        compiler_params=pltpu.CompilerParams(
            dimension_semantics=("parallel",)),
    )(x, bits, w_p, b_p)

    return out_padded[:, :L]


if __name__ == "__main__":
    # Shapes implied by the module: (batch, hidden) -> (batch, num_labels)
    batch, hidden, num_labels = 8, 32, 8
    K, p = 5, 0.5

    key = jax.random.PRNGKey(0)
    kx, kw, kb, kd = jax.random.split(key, 4)

    x = jax.random.normal(kx, (batch, hidden), dtype=jnp.float32)

    # Deterministic PyTorch-style Linear init: uniform(-1/sqrt(H), 1/sqrt(H)).
    bound = 1.0 / (hidden ** 0.5)
    w = jax.random.uniform(kw, (hidden, num_labels), jnp.float32, -bound, bound)
    b = jax.random.uniform(kb, (num_labels,), jnp.float32, -bound, bound)

    out = multi_sample_dropout(x, w, b, kd, K=K, p=p)
    jax.block_until_ready(out)

    assert out.shape == (batch, num_labels)
    assert out.dtype == jnp.float32
    assert bool(jnp.all(jnp.isfinite(out)))
    print("KERNEL_OK")
</pallas_src>

<mosaic_0001>
module attributes {stable_mosaic.version = 11 : i64} {
  func.func @_msd_kernel(%arg0: i32, %arg1: memref<8x32xf32, #tpu.memory_space<vmem>>, %arg2: memref<8x32xi32, #tpu.memory_space<vmem>>, %arg3: memref<32x128xbf16, #tpu.memory_space<vmem>>, %arg4: memref<1x128xf32, #tpu.memory_space<vmem>>, %arg5: memref<8x128xf32, #tpu.memory_space<vmem>>) attributes {dimension_semantics = [#tpu.dimension_semantics<parallel>], iteration_bounds = array<i64: 1>, scalar_prefetch = 0 : i64, scratch_operands = 0 : i64, tpu.core_type = #tpu.core_type<tc>, window_params = [{transform_indices = @transform_0, window_bounds = array<i64: 8, 32>}, {transform_indices = @transform_1, window_bounds = array<i64: 8, 32>}, {pipeline_mode = #tpu.pipeline_mode<synchronous>, transform_indices = @transform_2, window_bounds = array<i64: 32, 128>}, {pipeline_mode = #tpu.pipeline_mode<synchronous>, transform_indices = @transform_3, window_bounds = array<i64: 1, 128>}, {transform_indices = @transform_4, window_bounds = array<i64: 8, 128>}]} {
    %c0 = arith.constant 0 : index
    %c0_0 = arith.constant 0 : index
    %0 = vector.load %arg1[%c0, %c0_0] : memref<8x32xf32, #tpu.memory_space<vmem>>, vector<8x32xf32>
    %c0_1 = arith.constant 0 : index
    %c0_2 = arith.constant 0 : index
    %1 = vector.load %arg2[%c0_1, %c0_2] : memref<8x32xi32, #tpu.memory_space<vmem>>, vector<8x32xi32>
    %c63_i32 = arith.constant 63 : i32
    %2 = vector.broadcast %c63_i32 : i32 to vector<8x32xi32>
    %3 = arith.andi %1, %2 : vector<8x32xi32>
    %c32_i32 = arith.constant 32 : i32
    %4 = vector.broadcast %c32_i32 : i32 to vector<8x32xi32>
    %5 = arith.cmpi ult, %3, %4 : vector<8x32xi32>
    %6 = arith.extui %5 : vector<8x32xi1> to vector<8x32xi32>
    %c6_i32 = arith.constant 6 : i32
    %7 = vector.broadcast %c6_i32 : i32 to vector<8x32xi32>
    %8 = arith.shrui %1, %7 : vector<8x32xi32>
    %c63_i32_3 = arith.constant 63 : i32
    %9 = vector.broadcast %c63_i32_3 : i32 to vector<8x32xi32>
    %10 = arith.andi %8, %9 : vector<8x32xi32>
    %c32_i32_4 = arith.constant 32 : i32
    %11 = vector.broadcast %c32_i32_4 : i32 to vector<8x32xi32>
    %12 = arith.cmpi ult, %10, %11 : vector<8x32xi32>
    %13 = arith.extui %12 : vector<8x32xi1> to vector<8x32xi32>
    %14 = arith.addi %6, %13 : vector<8x32xi32>
    %c12_i32 = arith.constant 12 : i32
    %15 = vector.broadcast %c12_i32 : i32 to vector<8x32xi32>
    %16 = arith.shrui %1, %15 : vector<8x32xi32>
    %c63_i32_5 = arith.constant 63 : i32
    %17 = vector.broadcast %c63_i32_5 : i32 to vector<8x32xi32>
    %18 = arith.andi %16, %17 : vector<8x32xi32>
    %c32_i32_6 = arith.constant 32 : i32
    %19 = vector.broadcast %c32_i32_6 : i32 to vector<8x32xi32>
    %20 = arith.cmpi ult, %18, %19 : vector<8x32xi32>
    %21 = arith.extui %20 : vector<8x32xi1> to vector<8x32xi32>
    %22 = arith.addi %14, %21 : vector<8x32xi32>
    %c18_i32 = arith.constant 18 : i32
    %23 = vector.broadcast %c18_i32 : i32 to vector<8x32xi32>
    %24 = arith.shrui %1, %23 : vector<8x32xi32>
    %c63_i32_7 = arith.constant 63 : i32
    %25 = vector.broadcast %c63_i32_7 : i32 to vector<8x32xi32>
    %26 = arith.andi %24, %25 : vector<8x32xi32>
    %c32_i32_8 = arith.constant 32 : i32
    %27 = vector.broadcast %c32_i32_8 : i32 to vector<8x32xi32>
    %28 = arith.cmpi ult, %26, %27 : vector<8x32xi32>
    %29 = arith.extui %28 : vector<8x32xi1> to vector<8x32xi32>
    %30 = arith.addi %22, %29 : vector<8x32xi32>
    %c24_i32 = arith.constant 24 : i32
    %31 = vector.broadcast %c24_i32 : i32 to vector<8x32xi32>
    %32 = arith.shrui %1, %31 : vector<8x32xi32>
    %c63_i32_9 = arith.constant 63 : i32
    %33 = vector.broadcast %c63_i32_9 : i32 to vector<8x32xi32>
    %34 = arith.andi %32, %33 : vector<8x32xi32>
    %c32_i32_10 = arith.constant 32 : i32
    %35 = vector.broadcast %c32_i32_10 : i32 to vector<8x32xi32>
    %36 = arith.cmpi ult, %34, %35 : vector<8x32xi32>
    %37 = arith.extui %36 : vector<8x32xi1> to vector<8x32xi32>
    %38 = arith.addi %30, %37 : vector<8x32xi32>
    %39 = arith.sitofp %38 : vector<8x32xi32> to vector<8x32xf32>
    %cst = arith.constant 4.000000e-01 : f32
    %40 = vector.broadcast %cst : f32 to vector<8x32xf32>
    %41 = arith.mulf %39, %40 : vector<8x32xf32>
    %42 = arith.mulf %0, %41 : vector<8x32xf32>
    %43 = arith.truncf %42 : vector<8x32xf32> to vector<8x32xbf16>
    %c0_11 = arith.constant 0 : index
    %c0_12 = arith.constant 0 : index
    %44 = vector.load %arg3[%c0_11, %c0_12] : memref<32x128xbf16, #tpu.memory_space<vmem>>, vector<32x128xbf16>
    %cst_13 = arith.constant dense<0.000000e+00> : vector<8x128xf32>
    %45 = tpu.matmul %43, %44, %cst_13 {dimension_numbers = #tpu.dot_dimension_numbers<[1], [0], [0], [1], [0, 0, 1, 1], [], []>} : vector<8x32xbf16>, vector<32x128xbf16>, vector<8x128xf32> -> vector<8x128xf32>
    %c0_14 = arith.constant 0 : index
    %c0_15 = arith.constant 0 : index
    %46 = vector.load %arg4[%c0_14, %c0_15] : memref<1x128xf32, #tpu.memory_space<vmem>>, vector<1x128xf32>
    %47 = vector.broadcast %46 : vector<1x128xf32> to vector<8x128xf32>
    %48 = arith.addf %45, %47 : vector<8x128xf32>
    %c0_16 = arith.constant 0 : index
    %c0_17 = arith.constant 0 : index
    %49 = vector.load %arg5[%c0_16, %c0_17] : memref<8x128xf32, #tpu.memory_space<vmem>>, vector<8x128xf32>
    tpu.vector_store %arg5[%c0_16, %c0_17], %48 {strides = array<i32>} : memref<8x128xf32, #tpu.memory_space<vmem>>, vector<8x128xf32>,
    return
  }
  func.func @transform_0(%arg0: i32) -> (i32, i32) {
    %c0_i32 = arith.constant 0 : i32
    %c0_i32_0 = arith.constant 0 : i32
    return %arg0, %c0_i32 : i32, i32
  }
  func.func @transform_1(%arg0: i32) -> (i32, i32) {
    %c0_i32 = arith.constant 0 : i32
    %c0_i32_0 = arith.constant 0 : i32
    return %arg0, %c0_i32 : i32, i32
  }
  func.func @transform_2(%arg0: i32) -> (i32, i32) {
    %c0_i32 = arith.constant 0 : i32
    %c0_i32_0 = arith.constant 0 : i32
    %c0_i32_1 = arith.constant 0 : i32
    return %c0_i32, %c0_i32_0 : i32, i32
  }
  func.func @transform_3(%arg0: i32) -> (i32, i32) {
    %c0_i32 = arith.constant 0 : i32
    %c0_i32_0 = arith.constant 0 : i32
    %c0_i32_1 = arith.constant 0 : i32
    return %c0_i32, %c0_i32_0 : i32, i32
  }
  func.func @transform_4(%arg0: i32) -> (i32, i32) {
    %c0_i32 = arith.constant 0 : i32
    %c0_i32_0 = arith.constant 0 : i32
    return %arg0, %c0_i32 : i32, i32
  }
}

</mosaic_0001>

<bundles_post_ra>
// kernel: tpu_custom_call.1
= control target key start
LH: loop header
LB: loop body
LE: loop exit
PB: predicated region body
PF: predicated region fallthrough
CT: control target
= control target key end

     0   :  { %9 = vsyncpa [#allocation3], 0  ;;  %s330_s0 = inlined_call_operand.hbm [shape: f32[8,32], index: 0, kind: input, shape index: {}]   ;;  %s331_s1 = inlined_call_operand.hbm [shape: u32[8,32], index: 1, kind: input, shape index: {}]   ;;  %s332_s2 = inlined_call_operand.hbm [shape: bf16[32,128], index: 2, kind: input, shape index: {}]   ;;  %s333_s3 = inlined_call_operand.vmem [shape: f32[1,128], index: 3, kind: input, shape index: {}]   ;;  %s334_s4 = inlined_call_operand.hbm [shape: f32[8,128], index: 4, kind: output, shape index: {}]  }
   0x1   :  { %10 = vsyncpa [#allocation6], 0 }
   0x2   :  { %11 = vsyncpa [#allocation4], 0  ;;  %s281_s15 = smov [#allocation5]   ;;  %s282_s17 = smov [#allocation2]  }
   0x3   :  { %s28_s16 = sshll.u32 %s281_s15, 4  ;;  %s18_s18 = sshll.u32 %s282_s17, 4  ;;  %s29_s16 = int_to_ptr.vmem [resolvable:$true] %s28_s16  ;;  %s19_s18 = int_to_ptr.vmem [resolvable:$true] %s18_s18 }
   0x4   :  { %s203_s19 = scalar_lea.vmem %s29_s16, 128  ;;  %p208_p1 = scmp.lt.s32.totalorder %s29_s16, %s29_s16 }
   0x5   :  { %p204_p0 = scmp.ne.s32.totalorder %s29_s16, %s203_s19  ;;  %p209_p2 = scmp.lt.s32.totalorder %s203_s19, %s203_s19 }
   0x7   :  { %p210_p3 = por %p209_p2, %p208_p1 }
   0x9   :  { %p211_p4 = pnand %p210_p3, %p204_p0 }
   0xb   :  { %214 = shalt.err (!%p211_p4)
}
   0xc   :  { %31 = dma.hbm_to_vmem [thread:$0]  %s331_s1, 128, %s29_s16, [#allocation6]  }
   0xd   :  { %s223_s22 = scalar_lea.vmem %s19_s18, 128  ;;  %p228_p6 = scmp.lt.s32.totalorder %s19_s18, %s19_s18 }
   0xe   :  { %p224_p5 = scmp.ne.s32.totalorder %s19_s18, %s223_s22  ;;  %p229_p7 = scmp.lt.s32.totalorder %s223_s22, %s223_s22 }
  0x10   :  { %p230_p8 = por %p229_p7, %p228_p6 }
  0x12   :  { %p231_p9 = pnand %p230_p8, %p224_p5 }
  0x14   :  { %234 = shalt.err (!%p231_p9)
}
  0x15   :  { %21 = dma.hbm_to_vmem [thread:$0]  %s330_s0, 128, %s19_s18, [#allocation3]  }
  0x16   :  { %s283_s25 = smov [#allocation7]  }
  0x17   :  { %s37_s26 = sshll.u32 %s283_s25, 4  ;;  %s38_s26 = int_to_ptr.vmem [resolvable:$true] %s37_s26 }
  0x18   :  { %s243_s27 = scalar_lea.vmem %s38_s26, 256  ;;  %p248_p11 = scmp.lt.s32.totalorder %s38_s26, %s38_s26 }
  0x19   :  { %p244_p10 = scmp.ne.s32.totalorder %s38_s26, %s243_s27  ;;  %p249_p12 = scmp.lt.s32.totalorder %s243_s27, %s243_s27 }
  0x1b   :  { %p250_p13 = por %p249_p12, %p248_p11 }
  0x1d   :  { %p251_p0 = pnand %p250_p13, %p244_p10 }
  0x1f   :  { %254 = shalt.err (!%p251_p0)
}
  0x20   :  { %s284_s1 = smov 64   ;;  %s285_s28 = smov 4  }
  0x21   :  { %43 = dma.hbm_to_vmem [thread:$0]  %s332_s2, 256, %s38_s26, [#allocation6], %s284_s1, %s284_s1, %s285_s28  }
  0x22   :  { %275 = dma.done.wait [#allocation3], 128  }
  0x23   :  { %276 = vsyncadd [#allocation3], 4294967168 }
  0x24   :  { %277 = dma.done.wait [#allocation6], 384  }
  0x25   :  { %278 = vsyncadd [#allocation6], 4294966912  ;;  %v286_v0 = vmov 0.0   ;;  %vm287_vm0 = vmmov 0   ;;  %v193_v1 = vld [vmem:[#allocation7 + $0x8] sm:$0xff]   ;;  %v194_v2 = vld [vmem:[#allocation7] sm:$0xff]  }
  0x26   :  { %176 = vmatprep.subr.bf16.mxu0 %v286_v0  ;;  %180 = vmatprep.mubr.msk.bf16.mxu0 %vm287_vm0, %v286_v0  ;;  %v57_v3 = vld [vmem:[#allocation5] sm:$0xff]  ;;  %v288_v12 = vmov 0   ;;  %v56_v24 = vld [vmem:[#allocation2] sm:$0xff]  ;;  %vm108_vm6 = vcmask 261120   ;;  %s289_s5 = smov [#allocation8]  }
  0x27   :  { %177 = vmatpush3.bf16.msra.mxu0 %v193_v1  ;;  %v58_v4 = vand.u32 63, %v57_v3  ;;  %v61_v5 = vshrl.u32 %v57_v3, 6  ;;  %v66_v6 = vshrl.u32 %v57_v3, 12  ;;  %v71_v7 = vshrl.u32 %v57_v3, 18  ;;  %v169_v28 = vld [vmem:[%s333_s3] ss:$0 sm:$0xff] }
  0x28   :  { %178 = vmatprep.subr.bf16.mxu0 %v286_v0  ;;  %v76_v8 = vshrl.u32 %v57_v3, 24  ;;  %s159_s6 = sshll.u32 %s289_s5, 4  ;;  %s160_s6 = int_to_ptr.vmem [resolvable:$true] %s159_s6 }
  0x29   :  { %vm59_vm1 = vcmp.lt.u32.totalorder %v58_v4, 32  ;;  %v62_v9 = vand.u32 63, %v61_v5  ;;  %v67_v10 = vand.u32 63, %v66_v6  ;;  %v72_v11 = vand.u32 63, %v71_v7  ;;  %s255_s7 = scalar_lea.vmem %s160_s6, 128  ;;  %p260_p2 = scmp.lt.s32.totalorder %s160_s6, %s160_s6 }
  0x2a   :  { %v60_v13 = vsel %vm59_vm1, 1, %v288_v12  ;;  %v77_v14 = vand.u32 63, %v76_v8  ;;  %p256_p1 = scmp.ne.s32.totalorder %s160_s6, %s255_s7  ;;  %p261_p3 = scmp.lt.s32.totalorder %s255_s7, %s255_s7 }
  0x2b   :  { %179 = vmatpush3.bf16.msra.mxu0 %v194_v2  ;;  %vm63_vm2 = vcmp.lt.u32.totalorder %v62_v9, 32  ;;  %vm68_vm3 = vcmp.lt.u32.totalorder %v67_v10, 32  ;;  %vm73_vm4 = vcmp.lt.u32.totalorder %v72_v11, 32 }
  0x2c   :  { %v64_v15 = vsel %vm63_vm2, 1, %v288_v12  ;;  %v69_v16 = vsel %vm68_vm3, 1, %v288_v12  ;;  %vm78_vm5 = vcmp.lt.u32.totalorder %v77_v14, 32  ;;  %v74_v18 = vsel %vm73_vm4, 1, %v288_v12  ;;  %p262_p4 = por %p261_p3, %p260_p2 }
  0x2d   :  { %v65_v17 = vadd.s32 %v64_v15, %v60_v13  ;;  %v79_v20 = vsel %vm78_vm5, 1, %v288_v12 }
  0x2e   :  { %p263_p5 = pnand %p262_p4, %p256_p1 }
  0x2f   :  { %v70_v19 = vadd.s32 %v69_v16, %v65_v17 }
  0x31   :  { %v75_v21 = vadd.s32 %v74_v18, %v70_v19 }
  0x33   :  { %v80_v22 = vadd.s32 %v79_v20, %v75_v21 }
  0x35   :  { %v81_v23 = vcvt.s32.f32 %v80_v22 }
  0x37   :  { %v82_v25 = vmul.f32 0.4, %v81_v23 }
  0x39   :  { %v83_v26 = vmul.f32 %v82_v25, %v56_v24 }
  0x3b   :  { %v84_v27 = vpack.c.bf16 %v83_v26, %v83_v26 }
  0x3d   :  { %181 = vmatmul.mubr.msk.bf16.vlgmr.msra.gmra.mxu0 %vm108_vm6, %v84_v27 }
  0xfd   :  { %v146_v29 = vpop.f32.mrf.mxu0 }
  0xfe   :  { %v147_v30 = vadd.f32 %v169_v28, %v146_v29 }
  0xff   :  { %v182_v31 = vpop.f32.mrf.mxu0 }
 0x100   :  { %152 = vst [vmem:[#allocation8] sm:$0xff] %v147_v30 }
 0x101   :  { %v149_v32 = vpop.f32.mrf.mxu0 }
 0x102   :  { %266 = shalt.err (!%p263_p5)
}
 0x103   :  { %162 = dma.vmem_to_hbm [thread:$0]  %s160_s6, 128, %s334_s4, [#allocation4]   ;;  %v183_v33 = vpop.f32.mrf.mxu0 }
 0x104   :  { %279 = dma.done.wait [#allocation4], 128  }
 0x105   :  { %280 = vsyncadd [#allocation4], 4294967168 }
 0x106   :  { %166 = vsyncpa [#allocation3], 1 }
 0x107   :  { %167 = vsyncpa [#allocation6], 1 }
 0x108   :  { %168 = vsyncpa [#allocation4], 1 }

</bundles_post_ra>
